<compile_context>
chip_gen: v6e
topology: v6e:2x2x1
jax: 0.10.0
libtpu: 0.0.40
codegen_flags: <defaults>
</compile_context>

<pallas_src>
import functools
from collections import namedtuple

import jax
import jax.numpy as jnp
from jax.experimental import pallas as pl
from jax.experimental.pallas import tpu as pltpu


def _cdiv(a, b):
    return -(-a // b)


def _lf_loss_kernel(src_ref, tgt_ref, out_ref, acc_ref, *,
                    w, hw_total, lo, hi, chunk0, bhw, bnc,
                    nc_total, need_row_mask):
    """Sum of squared diffs over the crop window for one N*C row-block.

    Grid = (i over N*C row-blocks [parallel], j over flat H*W chunks
    [arbitrary, reduction]).  acc_ref is a (1, bhw) f32 running per-lane
    partial; the finalize step reduces it to this row-block's scalar partial.
    """
    i = pl.program_id(0)
    j = pl.program_id(1)

    @pl.when(j == 0)
    def _init():
        acc_ref[...] = jnp.zeros_like(acc_ref)

    src = src_ref[...].astype(jnp.float32)
    tgt = tgt_ref[...].astype(jnp.float32)
    d = src - tgt
    sq = d * d

    # Crop mask generated in-kernel from iota (no third DMA stream).  Pure
    # VPU integer work -- free filler under the HBM-bound roofline.
    lane = jax.lax.broadcasted_iota(jnp.int32, (1, bhw), 1)
    pos = lane + (chunk0 + j) * bhw                 # flat position in [0, H*W)
    if (w & (w - 1)) == 0:                          # power-of-two width
        shift = w.bit_length() - 1
        hh = pos >> shift
        ww = pos & (w - 1)
    else:
        hh = pos // w
        ww = pos - hh * w
    keep = ((pos < hw_total) & (hh >= lo) & (hh < hi)
            & (ww >= lo) & (ww < hi))
    if need_row_mask:
        rows = jax.lax.broadcasted_iota(jnp.int32, sq.shape, 0) + i * bnc
        keep = jnp.logical_and(keep, rows < nc_total)

    # Select (not mask-multiply): OOB / padded lanes may hold NaN/Inf.
    masked = jnp.where(keep, sq, 0.0)

    # Per-step sublane reduction into a tiny (1, bhw) accumulator: no
    # block-sized scratch, no extra vld/vst per computed vreg; the
    # cross-sublane reduce rides the otherwise-idle XLU slot.
    acc_ref[...] += jnp.sum(masked, axis=0, keepdims=True)

    @pl.when(j == pl.num_programs(1) - 1)
    def _finalize():
        out_ref[0, 0] = jnp.sum(acc_ref[...])


def _pick_hw_chunking(hw_total, w, lo, hi, block_hw, nc_total, grid_nc):
    """Pick a 128-aligned flat-H*W chunk size/offset covering the crop rows
    [lo*w, hi*w) with minimal HBM over-fetch, traded against per-step
    overhead (~0.35 us of HBM time ~ 1e5 f32 elements)."""
    flat_lo, flat_hi = lo * w, hi * w
    cands = [k * 128 for k in range(1, min(block_hw, hw_total) // 128 + 1)]
    if hw_total <= block_hw:
        cands.append(hw_total)                      # full dim: always legal
    if not cands:
        cands = [hw_total]                          # tiny plane fallback
    STEP_OVERHEAD_ELEMS = 100_000
    best = None
    for bhw in sorted(set(cands)):
        c0 = flat_lo // bhw
        g = _cdiv(flat_hi, bhw) - c0
        fetched = g * bhw * nc_total * 2            # src + tgt elements DMA'd
        cost = fetched + grid_nc * g * STEP_OVERHEAD_ELEMS
        key = (cost, -bhw)                          # ties -> fewer, bigger steps
        if best is None or key < best[0]:
            best = (key, bhw, c0, g)
    return best[1], best[2], best[3]


def lf_loss(src_magnitude, tgt_magnitude, *, size, sigma,
            block_nc=512, block_hw=2048, vmem_limit_bytes=None):
    """Pallas TPU implementation of LFLoss.forward.  Returns a float32 scalar.

    loss = sqrt(mean((src[..., lo:hi, lo:hi] - tgt[..., lo:hi, lo:hi])**2)),
    lo = size//2 - sigma, hi = size//2 + sigma  (NCHW inputs).
    """
    assert src_magnitude.shape == tgt_magnitude.shape
    assert src_magnitude.dtype == tgt_magnitude.dtype
    n, c, h, w = src_magnitude.shape
    dc = size // 2
    lo, hi = dc - sigma, dc + sigma
    assert 0 <= lo < hi and hi <= h and hi <= w, "crop window outside plane"

    NC, HW = n * c, h * w
    itemsize = jnp.dtype(src_magnitude.dtype).itemsize

    # Free contiguous reshape to a lane-dense 2-D view (no data movement).
    src2 = src_magnitude.reshape(NC, HW)
    tgt2 = tgt_magnitude.reshape(NC, HW)

    # --- N*C row blocking (parallel grid axis; splits across v7x's 2 TCs) ---
    sub = {4: 8, 2: 16, 1: 32}.get(itemsize, 8)     # min sublane tile per dtype
    if NC <= block_nc:
        bnc = NC                                    # full dim: always legal
    else:
        assert block_nc >= sub, f"block_nc must be >= {sub} for this dtype"
        bnc = (block_nc // sub) * sub
    grid_nc = _cdiv(NC, bnc)
    need_row_mask = (grid_nc * bnc != NC)

    # --- flat H*W chunking, aligned to the crop row span [lo*w, hi*w) -------
    bhw, chunk0, grid_hw = _pick_hw_chunking(HW, w, lo, hi, block_hw, NC, grid_nc)

    # --- VMEM budget: 2 inputs x 2 pipeline buffers + f32 temporaries -------
    if vmem_limit_bytes is None:
        in_block = bnc * bhw * itemsize
        f32_block = bnc * bhw * 4
        vmem_limit_bytes = 4 * in_block + 6 * f32_block + (2 << 20)
        vmem_limit_bytes = int(min(max(vmem_limit_bytes, 32 << 20), 64 << 20))

    count = NC * (hi - lo) * (hi - lo)              # true crop element count
    inv_count = 1.0 / float(count)

    kernel = functools.partial(
        _lf_loss_kernel, w=w, hw_total=HW, lo=lo, hi=hi, chunk0=chunk0,
        bhw=bhw, bnc=bnc, nc_total=NC, need_row_mask=need_row_mask)

    partials = pl.pallas_call(
        kernel,
        out_shape=jax.ShapeDtypeStruct((grid_nc, 1), jnp.float32),
        grid_spec=pltpu.PrefetchScalarGridSpec(
            num_scalar_prefetch=0,
            grid=(grid_nc, grid_hw),
            in_specs=[
                pl.BlockSpec((bnc, bhw), lambda i, j: (i, chunk0 + j)),
                pl.BlockSpec((bnc, bhw), lambda i, j: (i, chunk0 + j)),
            ],
            # One scalar partial per row-block -> the N*C axis is independent
            # ("parallel"); the tiny sum + sqrt finishes in the wrapper.
            out_specs=pl.BlockSpec((1, 1), lambda i, j: (i, 0),
                                   memory_space=pltpu.SMEM),
            scratch_shapes=[pltpu.VMEM((1, bhw), jnp.float32)],
        ),
        compiler_params=pltpu.CompilerParams(
            dimension_semantics=("parallel", "arbitrary"),
            vmem_limit_bytes=vmem_limit_bytes),
    )(src2, tgt2)

    return jnp.sqrt(jnp.sum(partials) * inv_count)


if __name__ == "__main__":
    Opt = namedtuple("Opt", ["size", "sigma"])
    opt = Opt(size=16, sigma=4)            # dc_point = 8, crop = 8x8 window

    def ref_loss(s, t):
        dc, sg = opt.size // 2, opt.sigma
        sp = s[:, :, dc - sg:dc + sg, dc - sg:dc + sg].astype(jnp.float32)
        tp = t[:, :, dc - sg:dc + sg, dc - sg:dc + sg].astype(jnp.float32)
        return jnp.sqrt(jnp.mean((sp - tp) ** 2))

    key = jax.random.PRNGKey(0)
    k1, k2, k3, k4 = jax.random.split(key, 4)

    # Case 1: NCHW (2,4,16,16); block_hw forced small so the toy shape
    # exercises the multi-chunk accumulate / finalize path (grid = (1, 2)).
    src = jax.random.normal(k1, (2, 4, 16, 16), dtype=jnp.float32)
    tgt = jax.random.normal(k2, (2, 4, 16, 16), dtype=jnp.float32)
    loss = lf_loss(src, tgt, size=opt.size, sigma=opt.sigma, block_hw=128)
    jax.block_until_ready(loss)
    assert jnp.allclose(loss, ref_loss(src, tgt), rtol=1e-5, atol=1e-6), loss

    # Case 2: N*C (=40) not a multiple of block_nc (=16) -> exercises the
    # padded-row mask, multiple parallel row-blocks, and the wrapper combine.
    src2 = jax.random.normal(k3, (2, 20, 16, 16), dtype=jnp.float32)
    tgt2 = jax.random.normal(k4, (2, 20, 16, 16), dtype=jnp.float32)
    loss2 = lf_loss(src2, tgt2, size=opt.size, sigma=opt.sigma,
                    block_nc=16, block_hw=128)
    jax.block_until_ready(loss2)
    assert jnp.allclose(loss2, ref_loss(src2, tgt2), rtol=1e-5, atol=1e-6), loss2

    # Case 3: bf16 inputs (halves HBM bytes); in-kernel f32 accumulation.
    sb, tb = src2.astype(jnp.bfloat16), tgt2.astype(jnp.bfloat16)
    loss3 = lf_loss(sb, tb, size=opt.size, sigma=opt.sigma,
                    block_nc=16, block_hw=128)
    jax.block_until_ready(loss3)
    assert jnp.allclose(loss3, ref_loss(sb, tb), rtol=1e-5, atol=1e-6), loss3

    print("KERNEL_OK")
</pallas_src>

<mosaic_0001>
module attributes {stable_mosaic.version = 11 : i64} {
  func.func @_lf_loss_kernel(%arg0: i32, %arg1: i32, %arg2: memref<8x128xf32, #tpu.memory_space<vmem>>, %arg3: memref<8x128xf32, #tpu.memory_space<vmem>>, %arg4: memref<1x1xf32, #tpu.memory_space<smem>>, %arg5: memref<1x128xf32, #tpu.memory_space<vmem>>) attributes {dimension_semantics = [#tpu.dimension_semantics<parallel>, #tpu.dimension_semantics<arbitrary>], iteration_bounds = array<i64: 1, 2>, scalar_prefetch = 0 : i64, scratch_operands = 1 : i64, tpu.core_type = #tpu.core_type<tc>, window_params = [{transform_indices = @transform_0, window_bounds = array<i64: 8, 128>}, {transform_indices = @transform_1, window_bounds = array<i64: 8, 128>}, {transform_indices = @transform_2, window_bounds = array<i64: 1, 1>}]} {
    %c0_i32 = arith.constant 0 : i32
    %0 = arith.cmpi eq, %arg1, %c0_i32 : i32
    %1 = arith.extui %0 : i1 to i32
    %c0_i32_0 = arith.constant 0 : i32
    %2 = arith.cmpi ne, %1, %c0_i32_0 : i32
    scf.if %2 {
      %cst_14 = arith.constant 0.000000e+00 : f32
      %42 = vector.broadcast %cst_14 : f32 to vector<1x128xf32>
      %c0_15 = arith.constant 0 : index
      %c0_16 = arith.constant 0 : index
      %43 = vector.load %arg5[%c0_15, %c0_16] : memref<1x128xf32, #tpu.memory_space<vmem>>, vector<1x128xf32>
      tpu.vector_store %arg5[%c0_15, %c0_16], %42 {strides = array<i32>} : memref<1x128xf32, #tpu.memory_space<vmem>>, vector<1x128xf32>,
    } else {
    }
    %c0 = arith.constant 0 : index
    %c0_1 = arith.constant 0 : index
    %3 = vector.load %arg2[%c0, %c0_1] : memref<8x128xf32, #tpu.memory_space<vmem>>, vector<8x128xf32>
    %c0_2 = arith.constant 0 : index
    %c0_3 = arith.constant 0 : index
    %4 = vector.load %arg3[%c0_2, %c0_3] : memref<8x128xf32, #tpu.memory_space<vmem>>, vector<8x128xf32>
    %5 = arith.subf %3, %4 : vector<8x128xf32>
    %6 = arith.mulf %5, %5 : vector<8x128xf32>
    %7 = tpu.iota {dimensions = array<i32: 1>} : vector<1x128xi32>
    %c0_i32_4 = arith.constant 0 : i32
    %8 = arith.addi %c0_i32_4, %arg1 : i32
    %c128_i32 = arith.constant 128 : i32
    %9 = arith.muli %8, %c128_i32 : i32
    %10 = vector.broadcast %9 : i32 to vector<1x128xi32>
    %11 = arith.addi %7, %10 : vector<1x128xi32>
    %c4_i32 = arith.constant 4 : i32
    %12 = vector.broadcast %c4_i32 : i32 to vector<1x128xi32>
    %13 = arith.shrsi %11, %12 : vector<1x128xi32>
    %c15_i32 = arith.constant 15 : i32
    %14 = vector.broadcast %c15_i32 : i32 to vector<1x128xi32>
    %15 = arith.andi %11, %14 : vector<1x128xi32>
    %c256_i32 = arith.constant 256 : i32
    %16 = vector.broadcast %c256_i32 : i32 to vector<1x128xi32>
    %17 = arith.cmpi slt, %11, %16 : vector<1x128xi32>
    %c4_i32_5 = arith.constant 4 : i32
    %18 = vector.broadcast %c4_i32_5 : i32 to vector<1x128xi32>
    %19 = arith.cmpi sge, %13, %18 : vector<1x128xi32>
    %20 = arith.andi %17, %19 : vector<1x128xi1>
    %c12_i32 = arith.constant 12 : i32
    %21 = vector.broadcast %c12_i32 : i32 to vector<1x128xi32>
    %22 = arith.cmpi slt, %13, %21 : vector<1x128xi32>
    %23 = arith.andi %20, %22 : vector<1x128xi1>
    %c4_i32_6 = arith.constant 4 : i32
    %24 = vector.broadcast %c4_i32_6 : i32 to vector<1x128xi32>
    %25 = arith.cmpi sge, %15, %24 : vector<1x128xi32>
    %26 = arith.andi %23, %25 : vector<1x128xi1>
    %c12_i32_7 = arith.constant 12 : i32
    %27 = vector.broadcast %c12_i32_7 : i32 to vector<1x128xi32>
    %28 = arith.cmpi slt, %15, %27 : vector<1x128xi32>
    %29 = arith.andi %26, %28 : vector<1x128xi1>
    %cst = arith.constant 0.000000e+00 : f32
    %30 = vector.shape_cast %29 : vector<1x128xi1> to vector<1x128xi1>
    %31 = vector.broadcast %30 : vector<1x128xi1> to vector<8x128xi1>
    %32 = vector.broadcast %cst : f32 to vector<8x128xf32>
    %33 = arith.select %31, %6, %32 : vector<8x128xi1>, vector<8x128xf32>
    %c0_8 = arith.constant 0 : index
    %c0_9 = arith.constant 0 : index
    %34 = vector.load %arg5[%c0_8, %c0_9] : memref<1x128xf32, #tpu.memory_space<vmem>>, vector<1x128xf32>
    %cst_10 = arith.constant dense<0.000000e+00> : vector<128xf32>
    %35 = vector.multi_reduction <add>, %33, %cst_10 [0] : vector<8x128xf32> to vector<128xf32>
    %36 = vector.shape_cast %35 : vector<128xf32> to vector<1x128xf32>
    %37 = arith.addf %34, %36 : vector<1x128xf32>
    %c0_11 = arith.constant 0 : index
    %c0_12 = arith.constant 0 : index
    %38 = vector.load %arg5[%c0_11, %c0_12] : memref<1x128xf32, #tpu.memory_space<vmem>>, vector<1x128xf32>
    tpu.vector_store %arg5[%c0_11, %c0_12], %37 {strides = array<i32>} : memref<1x128xf32, #tpu.memory_space<vmem>>, vector<1x128xf32>,
    %c1_i32 = arith.constant 1 : i32
    %39 = arith.cmpi eq, %arg1, %c1_i32 : i32
    %40 = arith.extui %39 : i1 to i32
    %c0_i32_13 = arith.constant 0 : i32
    %41 = arith.cmpi ne, %40, %c0_i32_13 : i32
    scf.if %41 {
      %c0_14 = arith.constant 0 : index
      %c0_15 = arith.constant 0 : index
      %42 = vector.load %arg5[%c0_14, %c0_15] : memref<1x128xf32, #tpu.memory_space<vmem>>, vector<1x128xf32>
      %43 = vector.shape_cast %42 : vector<1x128xf32> to vector<1x1x128xf32>
      %cst_16 = arith.constant dense<0.000000e+00> : vector<1xf32>
      %44 = vector.multi_reduction <add>, %43, %cst_16 [1, 2] : vector<1x1x128xf32> to vector<1xf32>
      %45 = vector.shape_cast %44 : vector<1xf32> to vector<1x1x1xf32>
      %46 = vector.extract %45[0, 0, 0] : f32 from vector<1x1x1xf32>
      %c0_17 = arith.constant 0 : index
      %c0_18 = arith.constant 0 : index
      %47 = memref.load %arg4[%c0_17, %c0_18] : memref<1x1xf32, #tpu.memory_space<smem>>
      memref.store %46, %arg4[%c0_17, %c0_18] : memref<1x1xf32, #tpu.memory_space<smem>>
    } else {
    }
    return
  }
  func.func @transform_0(%arg0: i32, %arg1: i32) -> (i32, i32) {
    %c0_i32 = arith.constant 0 : i32
    %0 = arith.addi %c0_i32, %arg1 : i32
    %c0_i32_0 = arith.constant 0 : i32
    return %arg0, %0 : i32, i32
  }
  func.func @transform_1(%arg0: i32, %arg1: i32) -> (i32, i32) {
    %c0_i32 = arith.constant 0 : i32
    %0 = arith.addi %c0_i32, %arg1 : i32
    %c0_i32_0 = arith.constant 0 : i32
    return %arg0, %0 : i32, i32
  }
  func.func @transform_2(%arg0: i32, %arg1: i32) -> (i32, i32) {
    %c0_i32 = arith.constant 0 : i32
    %c0_i32_0 = arith.constant 0 : i32
    return %arg0, %c0_i32 : i32, i32
  }
}

</mosaic_0001>

<bundles_post_ra>
// kernel: tpu_custom_call.1
= control target key start
LH: loop header
LB: loop body
LE: loop exit
PB: predicated region body
PF: predicated region fallthrough
CT: control target
= control target key end

     0   :  { %7 = vsyncpa [#allocation4], 0  ;;  %s725_s0 = inlined_call_operand.hbm [shape: f32[8,256], index: 0, kind: input, shape index: {}]   ;;  %s726_s1 = inlined_call_operand.hbm [shape: f32[8,256], index: 1, kind: input, shape index: {}]   ;;  %s727_s2 = inlined_call_operand.hbm [shape: f32[1,1], index: 2, kind: output, shape index: {}]  }
   0x1   :  { %9 = vsyncpa [#allocation4 + $0x1], 0 }
   0x2   :  { %10 = vsyncpa [#allocation7], 0 }
   0x3   :  { %12 = vsyncpa [#allocation7 + $0x1], 0 }
   0x4   :  { %13 = vsyncpa [#allocation5], 0  ;;  %s594_s9 = smov 0   ;;  %s596_s10 = smov 0  }
   0x5   :  { %s598_s11 = smov 0   ;;  %s600_s12 = smov 0  }
   0x6   :  { %s602_s13 = smov 0   ;;  %s604_s14 = smov 0  }
   0x7 LB: > { %s360_s15 = sadd.s32 4294967295, %s572_s14   ;;  %s28_s16 = sadd.s32 1, %s568_s13  ;;  %s572_s14 = sphi %s604_s14, %s19_s14   ;;  %s568_s13 = sphi %s602_s13, %s736_s13   ;;  %s564_s12 = sphi %s600_s12, %s735_s12   ;;  %s560_s11 = sphi %s598_s11, %s734_s11   ;;  %s556_s10 = sphi %s596_s10, %s733_s10   ;;  %s552_s9 = sphi %s594_s9, %s732_s9  }
   0x8   : > { %p29_p0 = scmp.ge.s32.totalorder %s28_s16, 2  ;;  %s40_s17 = sadd.s32 1, %s560_s11 }
   0x9   : > { %p47_p1 = scmp.ne.s32.totalorder %s560_s11, %s556_s10  ;;  %p48_p2 = scmp.eq.s32.totalorder %s572_s14, 0 }
   0xa   : > { %s738_s16 = smov (%p29_p0, %s28_s16), 0  ;;  %p53_p4 = scmp.ne.s32.totalorder %s556_s10, %s552_s9 }
   0xb   : > { %p630_p3 = por %p48_p2, %p47_p1  ;;  %s36_s19 = ssub.s32 %s568_s13, %s738_s16 }
   0xc   : > { %p54_p5 = scmp.eq.s32.totalorder %s360_s15, 0  ;;  %p38_p6 = scmp.eq.s32.totalorder %s36_s19, 0 }
   0xd   : > { %p394_p8 = scmp.lt.s32.totalorder %s572_s14, 2  ;;  %s648_s22 = sand.u32 1, %s560_s11  }
   0xe   : > { %p639_p7 = por %p54_p5, %p53_p4  ;;  %s364_s23 = sshll.u32 %s568_s13, 7 }
   0xf   : > { %s645_s21 = scalar_select %p38_p6, %s560_s11, %s40_s17  }
  0x10   : > { %s363_s24 = sshll.u32 %s648_s22, 3  ;;  %s142_s27 = scalar_lea.hbm %s725_s0, %s364_s23 }
  0x11   : > { %s135_s28 = scalar_lea.vmem [#allocation3], %s363_s24  ;;  %p657_p9 = pnand %p394_p8, %p630_p3 }
  0x12   : > { %s144_s29 = sshll.u32 %s135_s28, 4  ;;  %p367_p10 = scmp.ge.s32.totalorder %s572_s14, 1  ;;  %s145_s29 = int_to_ptr.vmem [resolvable:$true] %s144_s29 }
  0x13   : > { %p169_p11 = scmp.lt.s32.totalorder %s572_s14, 3  ;;  %s132_s3 = scalar_lea.sflag [#allocation4], %s648_s22 }
  0x14   : > { %p450_p12 = pneg %p657_p9  ;;  %s461_s4 = scalar_lea.vmem %s145_s29, 128 }
  0x15   : > { %p462_p13 = scmp.ne.s32.totalorder %s145_s29, %s461_s4  ;;  %s574_s5 = smov [#allocation3]  }
  0x16   : > { %s466_s6 = sshll.u32 %s574_s5, 4  ;;  %s467_s6 = int_to_ptr.vmem [resolvable:$false] %s466_s6 }
  0x17   : > { %p464_p0 = pnand %p462_p13, %p450_p12  ;;  %s468_s7 = scalar_lea.vmem %s467_s6, 256 }
  0x18   : > { %p469_p2 = scmp.lt.s32.totalorder %s145_s29, %s467_s6  ;;  %p470_p3 = scmp.lt.s32.totalorder %s468_s7, %s461_s4 }
  0x19   : > { %p465_p1 = pneg %p464_p0 }
  0x1a   : > { %p471_p4 = por %p470_p3, %p469_p2 }
  0x1c   : > { %p472_p5 = pnand %p471_p4, %p465_p1 }
  0x1e   : > { %475 = shalt.err (!%p472_p5)
}
  0x1f   : > { %390 = dma.hbm_to_vmem [thread:$0]  (!%p657_p9), %s142_s27, 128, %s145_s29, %s132_s3  }
  0x20   : > { %p675_p6 = pnand %p367_p10, %p169_p11  ;;  %s162_s18 = scalar_lea.hbm %s726_s1, %s364_s23 }
  0x21   : > { %s155_s19 = scalar_lea.vmem [#allocation6], %s363_s24  ;;  %s152_s26 = scalar_lea.sflag [#allocation7], %s648_s22 }
  0x22   : > { %s164_s25 = sshll.u32 %s155_s19, 4  ;;  %s575_s27 = smov [#allocation6]   ;;  %s165_s25 = int_to_ptr.vmem [resolvable:$true] %s164_s25 }
  0x23   : > { %s489_s28 = scalar_lea.vmem %s165_s25, 128  ;;  %s494_s29 = sshll.u32 %s575_s27, 4  ;;  %s495_s29 = int_to_ptr.vmem [resolvable:$false] %s494_s29 }
  0x24   : > { %p490_p8 = scmp.ne.s32.totalorder %s165_s25, %s489_s28  ;;  %s496_s3 = scalar_lea.vmem %s495_s29, 256 }
  0x25   : > { %p497_p10 = scmp.lt.s32.totalorder %s165_s25, %s495_s29  ;;  %p498_p11 = scmp.lt.s32.totalorder %s496_s3, %s489_s28 }
  0x26   : > { %p492_p13 = pnand %p490_p8, %p450_p12 }
  0x27   : > { %p499_p1 = por %p498_p11, %p497_p10 }
  0x28   : > { %p493_p0 = pneg %p492_p13 }
  0x2a   : > { %p500_p2 = pnand %p499_p1, %p493_p0 }
  0x2c   : > { %503 = shalt.err (!%p500_p2)
}
  0x2d   : > { %393 = dma.hbm_to_vmem [thread:$0]  (!%p657_p9), %s162_s18, 128, %s165_s25, %s152_s26  }
  0x2e   : > { %173 = sbr.rel (%p675_p6) target bundleno = 309 (0x135), region = 28  ;;  %s175_s22 = sand.u32 (!%p675_p6), 1, %s556_s10  }
  0x2f   : > { %s368_s23 = sshll.u32 (!%p675_p6), %s175_s22, 3  ;;  %s176_s24 = scalar_lea.sflag (!%p675_p6), [#allocation4], %s175_s22 }
  0x30   : > { %s179_s4 = scalar_lea.vmem (!%p675_p6), [#allocation3], %s368_s23 }
  0x33   : > { %539 = dma.done.wait (%p639_p7), %s176_s24, 128  }
  0x34   : > { %541 = vsyncadd (%p639_p7), %s176_s24, 4294967168  ;;  %s185_s5 = scalar_lea.sflag [#allocation7], %s175_s22  ;;  %s188_s6 = scalar_lea.vmem [#allocation6], %s368_s23 }
  0x35   : > { %543 = dma.done.wait (%p639_p7), %s185_s5, 128  }
  0x36   : > { %545 = vsyncadd (%p639_p7), %s185_s5, 4294967168  ;;  %p370_p9 = scmp.ne.s32.totalorder %s564_s12, 0 }
  0x38   : > { %212 = sbr.rel (%p370_p9) target bundleno = 63 (0x3f), region = 40 }
  0x3d   : > { %v576_v0 = vmov 0.0  }
  0x3e   : > { %213 = vst [vmem:[#allocation2] sm:$0x1] %v576_v0 }
  0x3f PF: > { %v218_v1 = vlaneseq  ;;  %s371_s30 = sshll.u32 %s564_s12, 7  ;;  %v214_v4 = vld [vmem:[%s179_s4] sm:$0xff]  ;;  %v215_v5 = vld [vmem:[%s188_s6] sm:$0xff]  ;;  %v577_v11 = vmov 0   ;;  %p372_p7 = scmp.ne.s32.totalorder %s564_s12, 1 }
  0x40   : > { %v221_v2 = vstv %s371_s30  ;;  %v216_v9 = vsub.f32 %v214_v4, %v215_v5 }
  0x41   : > { %v219_v3 = vand.u32 127, %v218_v1 }
  0x42   : > { %v217_v10 = vmul.f32 %v216_v9, %v216_v9 }
  0x43   : > { %v222_v6 = vadd.s32 %v221_v2, %v219_v3 }
  0x45   : > { %v223_v7 = vshra.s32 %v222_v6, 4  ;;  %v224_v8 = vand.u32 15, %v222_v6  ;;  %vm225_vm0 = vcmp.lt.s32.totalorder %v222_v6, 256  ;;  %v237_v19 = vld [vmem:[#allocation2] sm:$0x1] }
  0x47   : > { %vm226_vm1 = vcmp.ge.s32.totalorder %v223_v7, 4  ;;  %vm228_vm2 = vcmp.lt.s32.totalorder %v223_v7, 12  ;;  %vm230_vm3 = vcmp.ge.s32.totalorder %v224_v8, 4  ;;  %vm232_vm5 = vcmp.lt.s32.totalorder %v224_v8, 12 }
  0x48   : > { %vm227_vm4 = vmand %vm225_vm0, %vm226_vm1 }
  0x49   : > { %vm229_vm6 = vmand %vm227_vm4, %vm228_vm2 }
  0x4a   : > { %vm231_vm7 = vmand %vm229_vm6, %vm230_vm3 }
  0x4b   : > { %vm233_vm8 = vmand %vm231_vm7, %vm232_vm5 }
  0x4c   : > { %v234_v12 = vsel %vm233_vm8, 1, %v577_v11 }
  0x4d   : > { %vm235_vm9 = vcmp.eq.s32.totalorder %v234_v12, 1 }
  0x4e   : > { %v236_v13 = vsel %vm235_vm9, %v217_v10, 0.0 }
  0x4f   : > { %v238_v14 = vrot.slane %v236_v13, 4 }
  0x51   : > { %v239_v15 = vadd.f32 %v238_v14, %v236_v13 }
  0x53   : > { %v240_v16 = vrot.slane %v239_v15, 2 }
  0x55   : > { %v241_v17 = vadd.f32 %v240_v16, %v239_v15 }
  0x57   : > { %v242_v18 = vrot.slane %v241_v17, 1 }
  0x59   : > { %v243_v20 = vadd.f32 %v242_v18, %v241_v17  ;;  %249 = sbr.rel (%p372_p7) target bundleno = 303 (0x12f), region = 44 }
  0x5b   : > { %v244_v21 = vadd.f32 %v243_v20, %v237_v19 }
  0x5d   : > { %245 = vst [vmem:[#allocation2] sm:$0x1] %v244_v21 }
  0x5e   : > { %vm251_vm10 = vcmask 1040384  }
  0x64   : > { %v250_v22 = vld [vmem:[#allocation2] sm:$0x1] }
  0x65   : > { %v252_v23 = vsel %vm251_vm10, %v250_v22, 0.0 }
  0x66   : > { %253 = vadd.xlane.f32.xlu0 %v252_v23 }
  0xef   : > { %v254_v24 = vpop.xlane.xlu0 %253 }
  0xf0   : > { %v255_v25 = vrot.slane %v254_v24, 4 }
  0xf2   : > { %v256_v26 = vadd.f32 %v255_v25, %v254_v24 }
  0xf4   : > { %v257_v27 = vrot.slane %v256_v26, 2 }
  0xf6   : > { %v258_v28 = vadd.f32 %v257_v27, %v256_v26 }
  0xf8   : > { %v259_v29 = vrot.slane %v258_v28, 1 }
  0xfa   : > { %v260_v30 = vadd.f32 %v259_v29, %v258_v28 }
  0xfc   : > { %377 = vpush %v260_v30 }
 0x12d   : > { %s378_s20 = spop %377 }
 0x12e   : > { %263 = sst [smem:[#allocation8]] %s378_s20 }
 0x12f PF: > { %p395_p12 = scmp.eq.s32.totalorder %s360_s15, 1  ;;  %s578_s12 = smov [#allocation8]  }
 0x131   : > { %384 = dma.smem_to_hbm (%p395_p12), %s578_s12, 16, %s727_s2, [#allocation5]  }
 0x132   : > { %547 = dma.done.wait (%p395_p12), [#allocation5], 16  }
 0x133   : > { %549 = vsyncadd (%p395_p12), [#allocation5], 4294967280 }
 0x134   : > { %279 = sfence }
 0x135 PF: > { %s19_s14 = sadd.s32 1, %s572_s14   ;;  %s732_s9 = smov %s556_s10 }
 0x136   : > { %p16_p3 = scmp.ge.s32.totalorder %s19_s14, 4   ;;  %s733_s10 = smov %s560_s11 }
 0x137   : > { %s734_s11 = smov %s645_s21  ;;  %s735_s12 = smov %s568_s13 }
 0x138   : > { %s736_s13 = smov %s738_s16  ;;  %18 = sbr.rel (!%p16_p3) target bundleno = 7 (0x7), region = 88 }
 0x13d   :  { %285 = vsyncpa [#allocation4], 1 }
 0x13e   :  { %287 = vsyncpa [#allocation4 + $0x1], 1 }
 0x13f   :  { %288 = vsyncpa [#allocation7], 1 }
 0x140   :  { %290 = vsyncpa [#allocation7 + $0x1], 1 }
 0x141   :  { %291 = vsyncpa [#allocation5], 1 }
 0x142   :  { %293 = vsyncpa [#allocation5 + $0x1], 1 }

</bundles_post_ra>
